<compile_context>
chip_gen: v6e
topology: v6e:2x2x1
jax: 0.10.0
libtpu: 0.0.40
codegen_flags: <defaults>
</compile_context>

<pallas_src>
from functools import partial

import jax
import jax.numpy as jnp
from jax import lax
from jax.experimental import pallas as pl
from jax.experimental.pallas import tpu as pltpu


def _round_up(v, m):
    return (v + m - 1) // m * m


def _spatial_transform_kernel(x_ref, sg_ref, fl_ref, o_ref,
                              acc_ref, wgt_ref, idx_ref,
                              *, H, W, t_hw, k_dtype):
    hw_idx = pl.program_id(2)
    n_hw = pl.num_programs(2)
    t_p = o_ref.shape[2]

    @pl.when(hw_idx == 0)
    def _init():
        # Zero the per-(n, p-tile) accumulator.
        acc_ref[...] = jnp.zeros_like(acc_ref)

        # Hoisted per-P-tile coordinate math (reused across all HW steps).
        g = sg_ref[0] + fl_ref[0]                       # (2, t_p); row0=x, row1=y
        gx = g[0:1, :]
        gy = g[1:2, :]
        # Unnormalize (align_corners=True) and clamp to border.
        ix = jnp.clip((gx + 1.0) * (0.5 * (W - 1)), 0.0, float(W - 1))
        iy = jnp.clip((gy + 1.0) * (0.5 * (H - 1)), 0.0, float(H - 1))
        x0f = jnp.floor(ix)
        y0f = jnp.floor(iy)
        wx = ix - x0f                                   # in [0, 1); 0 at border
        wy = iy - y0f
        idx_ref[...] = y0f.astype(jnp.int32) * W + x0f.astype(jnp.int32)
        wgt_ref[0:1, :] = (1.0 - wx) * (1.0 - wy)       # w00
        wgt_ref[1:2, :] = wx * (1.0 - wy)               # w01
        wgt_ref[2:3, :] = (1.0 - wx) * wy               # w10
        wgt_ref[3:4, :] = wx * wy                       # w11

    # Build the (t_hw, t_p) interpolation-matrix tile with a single delta
    # index compared against immediates {0, 1, W, W+1}.
    d = (lax.broadcasted_iota(jnp.int32, (t_hw, t_p), 0)
         + hw_idx * t_hw) - idx_ref[...]
    zero = jnp.zeros((), dtype=k_dtype)
    w00 = wgt_ref[0:1, :].astype(k_dtype)
    w01 = wgt_ref[1:2, :].astype(k_dtype)
    w10 = wgt_ref[2:3, :].astype(k_dtype)
    w11 = wgt_ref[3:4, :].astype(k_dtype)
    K = (jnp.where(d == 0, w00, zero)
         + jnp.where(d == 1, w01, zero)
         + jnp.where(d == W, w10, zero)
         + jnp.where(d == W + 1, w11, zero))

    # (C, t_hw) @ (t_hw, t_p) -> accumulate in f32.
    acc_ref[...] += jnp.dot(x_ref[0].astype(k_dtype), K,
                            preferred_element_type=jnp.float32)

    @pl.when(hw_idx == n_hw - 1)
    def _finish():
        o_ref[...] = acc_ref[...][None].astype(o_ref.dtype)


def spatial_transform(x, flow, sample_grid, *, tile_p=512, tile_hw=1024,
                      k_dtype=jnp.float32):
    """x: (N, C, H, W); flow, sample_grid: (N, Ho, Wo, 2), last dim = (x, y)."""
    N, C, H, W = x.shape
    _, Ho, Wo, _ = sample_grid.shape
    HW = H * W
    P = Ho * Wo

    # Tile sizes: multiples of 128 (lane-dense output, aligned K tiles).
    # Defaults (512, 1024) fit comfortably in a 32 MiB VMEM budget on
    # v5e / v6e / v7x; v6e can go larger if desired.
    t_p = min(_round_up(tile_p, 128), _round_up(P, 128))
    t_hw = min(_round_up(tile_hw, 128), _round_up(HW, 128))
    P_pad = _round_up(P, t_p)
    HW_pad = _round_up(HW, t_hw)

    x_flat = x.reshape(N, C, HW)
    if HW_pad != HW:
        x_flat = jnp.pad(x_flat, ((0, 0), (0, 0), (0, HW_pad - HW)))
    sg = jnp.transpose(sample_grid, (0, 3, 1, 2)).reshape(N, 2, P).astype(jnp.float32)
    fl = jnp.transpose(flow, (0, 3, 1, 2)).reshape(N, 2, P).astype(jnp.float32)
    if P_pad != P:
        pad = ((0, 0), (0, 0), (0, P_pad - P))
        sg = jnp.pad(sg, pad)
        fl = jnp.pad(fl, pad)

    kernel = partial(_spatial_transform_kernel, H=H, W=W, t_hw=t_hw,
                     k_dtype=k_dtype)

    cost = pl.CostEstimate(
        flops=2 * N * C * HW_pad * P_pad,
        transcendentals=0,
        bytes_accessed=(x_flat.size * x_flat.dtype.itemsize
                        + sg.size * sg.dtype.itemsize
                        + fl.size * fl.dtype.itemsize
                        + N * C * P_pad * x.dtype.itemsize),
    )

    out = pl.pallas_call(
        kernel,
        out_shape=jax.ShapeDtypeStruct((N, C, P_pad), x.dtype),
        grid_spec=pltpu.PrefetchScalarGridSpec(
            num_scalar_prefetch=0,
            grid=(N, P_pad // t_p, HW_pad // t_hw),
            in_specs=[
                pl.BlockSpec((1, C, t_hw), lambda n, p, h: (n, 0, h)),
                pl.BlockSpec((1, 2, t_p), lambda n, p, h: (n, 0, p)),
                pl.BlockSpec((1, 2, t_p), lambda n, p, h: (n, 0, p)),
            ],
            out_specs=pl.BlockSpec((1, C, t_p), lambda n, p, h: (n, 0, p)),
            scratch_shapes=[
                pltpu.VMEM((C, t_p), jnp.float32),   # accumulator
                pltpu.VMEM((4, t_p), jnp.float32),   # bilinear weights w00..w11
                pltpu.VMEM((1, t_p), jnp.int32),     # flat top-left source index
            ],
        ),
        compiler_params=pltpu.CompilerParams(
            dimension_semantics=("parallel", "parallel", "arbitrary"),
            vmem_limit_bytes=32 * 1024 * 1024,
        ),
        cost_estimate=cost,
    )(x_flat, sg, fl)

    if P_pad != P:
        out = out[:, :, :P]
    return out.reshape(N, C, Ho, Wo)


def _ref_grid_sample(x, grid):
    """Pure-JAX reference: bilinear, border padding, align_corners=True."""
    N, C, H, W = x.shape
    gx = grid[..., 0]
    gy = grid[..., 1]
    ix = jnp.clip((gx + 1.0) * 0.5 * (W - 1), 0.0, W - 1.0)
    iy = jnp.clip((gy + 1.0) * 0.5 * (H - 1), 0.0, H - 1.0)
    x0 = jnp.floor(ix).astype(jnp.int32)
    y0 = jnp.floor(iy).astype(jnp.int32)
    x1 = jnp.minimum(x0 + 1, W - 1)
    y1 = jnp.minimum(y0 + 1, H - 1)
    wx = ix - x0
    wy = iy - y0

    def gather(xn, yi, xi):
        return xn[:, yi, xi]                  # (C, Ho, Wo)

    g = jax.vmap(gather)
    v00 = g(x, y0, x0)
    v01 = g(x, y0, x1)
    v10 = g(x, y1, x0)
    v11 = g(x, y1, x1)
    w00 = ((1 - wx) * (1 - wy))[:, None]
    w01 = (wx * (1 - wy))[:, None]
    w10 = ((1 - wx) * wy)[:, None]
    w11 = (wx * wy)[:, None]
    return w00 * v00 + w01 * v01 + w10 * v10 + w11 * v11


def _identity_grid(N, Ho, Wo):
    ys = jnp.linspace(-1.0, 1.0, Ho)
    xs = jnp.linspace(-1.0, 1.0, Wo)
    gyy, gxx = jnp.meshgrid(ys, xs, indexing="ij")
    base = jnp.stack([gxx, gyy], axis=-1)                 # (Ho, Wo, 2), (x, y)
    return jnp.broadcast_to(base, (N, Ho, Wo, 2)).astype(jnp.float32)


if __name__ == "__main__":
    key = jax.random.PRNGKey(0)
    k1, k2, k3, k4 = jax.random.split(key, 4)

    # Case 1: square shapes; small tiles force multiple P- and HW-tiles
    # (exercises the accumulator / pl.when init-finalize path).
    N, C, H, W = 2, 4, 16, 16
    x = jax.random.normal(k1, (N, C, H, W), dtype=jnp.float32)
    sgrid = _identity_grid(N, H, W)
    flow = 0.25 * jax.random.normal(k2, (N, H, W, 2), dtype=jnp.float32)
    out = jax.block_until_ready(
        spatial_transform(x, flow, sgrid, tile_p=128, tile_hw=128))
    ref = _ref_grid_sample(x, sgrid + flow)
    assert out.shape == (N, C, H, W)
    assert jnp.allclose(out, ref, atol=1e-4, rtol=1e-4), "case1 mismatch"

    # Case 2: zero flow on the identity grid -> pass-through (border corners
    # sit exactly on the clamp boundary; duplicate-corner weights must be 0).
    out_id = jax.block_until_ready(
        spatial_transform(x, jnp.zeros_like(flow), sgrid))   # default tiles
    assert jnp.allclose(out_id, x, atol=1e-4, rtol=1e-4), "case2 mismatch"

    # Case 3: non-square input, non-128-aligned output grid (exercises the
    # P / HW padding paths and multiple contraction steps).
    N2, C2, H2, W2, Ho2, Wo2 = 1, 3, 20, 24, 10, 12
    x2 = jax.random.normal(k3, (N2, C2, H2, W2), dtype=jnp.float32)
    sgrid2 = _identity_grid(N2, Ho2, Wo2)
    flow2 = 0.25 * jax.random.normal(k4, (N2, Ho2, Wo2, 2), dtype=jnp.float32)
    out2 = jax.block_until_ready(
        spatial_transform(x2, flow2, sgrid2, tile_p=128, tile_hw=128))
    ref2 = _ref_grid_sample(x2, sgrid2 + flow2)
    assert out2.shape == (N2, C2, Ho2, Wo2)
    assert jnp.allclose(out2, ref2, atol=1e-4, rtol=1e-4), "case3 mismatch"

    print("KERNEL_OK")
</pallas_src>

<mosaic_0001>
module attributes {stable_mosaic.version = 11 : i64} {
  func.func @_spatial_transform_kernel(%arg0: i32, %arg1: i32, %arg2: i32, %arg3: memref<1x4x128xf32, #tpu.memory_space<vmem>>, %arg4: memref<1x2x128xf32, #tpu.memory_space<vmem>>, %arg5: memref<1x2x128xf32, #tpu.memory_space<vmem>>, %arg6: memref<1x4x128xf32, #tpu.memory_space<vmem>>, %arg7: memref<4x128xf32, #tpu.memory_space<vmem>>, %arg8: memref<4x128xf32, #tpu.memory_space<vmem>>, %arg9: memref<1x128xi32, #tpu.memory_space<vmem>>) attributes {dimension_semantics = [#tpu.dimension_semantics<parallel>, #tpu.dimension_semantics<parallel>, #tpu.dimension_semantics<arbitrary>], iteration_bounds = array<i64: 2, 2, 2>, scalar_prefetch = 0 : i64, scratch_operands = 3 : i64, tpu.core_type = #tpu.core_type<tc>, window_params = [{transform_indices = @transform_0, window_bounds = array<i64: 1, 4, 128>}, {transform_indices = @transform_1, window_bounds = array<i64: 1, 2, 128>}, {transform_indices = @transform_2, window_bounds = array<i64: 1, 2, 128>}, {transform_indices = @transform_3, window_bounds = array<i64: 1, 4, 128>}]} {
    %c0_i32 = arith.constant 0 : i32
    %0 = arith.cmpi eq, %arg2, %c0_i32 : i32
    %1 = arith.extui %0 : i1 to i32
    %c0_i32_0 = arith.constant 0 : i32
    %2 = arith.cmpi ne, %1, %c0_i32_0 : i32
    scf.if %2 {
      %cst_21 = arith.constant 0.000000e+00 : f32
      %50 = vector.broadcast %cst_21 : f32 to vector<4x128xf32>
      %c0_22 = arith.constant 0 : index
      %c0_23 = arith.constant 0 : index
      %51 = vector.load %arg7[%c0_22, %c0_23] : memref<4x128xf32, #tpu.memory_space<vmem>>, vector<4x128xf32>
      tpu.vector_store %arg7[%c0_22, %c0_23], %50 {strides = array<i32>} : memref<4x128xf32, #tpu.memory_space<vmem>>, vector<4x128xf32>,
      %c0_24 = arith.constant 0 : index
      %c0_25 = arith.constant 0 : index
      %c0_26 = arith.constant 0 : index
      %52 = vector.load %arg4[%c0_24, %c0_25, %c0_26] : memref<1x2x128xf32, #tpu.memory_space<vmem>>, vector<1x2x128xf32>
      %53 = vector.shape_cast %52 : vector<1x2x128xf32> to vector<2x128xf32>
      %c0_27 = arith.constant 0 : index
      %c0_28 = arith.constant 0 : index
      %c0_29 = arith.constant 0 : index
      %54 = vector.load %arg5[%c0_27, %c0_28, %c0_29] : memref<1x2x128xf32, #tpu.memory_space<vmem>>, vector<1x2x128xf32>
      %55 = vector.shape_cast %54 : vector<1x2x128xf32> to vector<2x128xf32>
      %56 = arith.addf %53, %55 : vector<2x128xf32>
      %57 = vector.extract_strided_slice %56 {offsets = [0, 0], sizes = [1, 128], strides = [1, 1]} : vector<2x128xf32> to vector<1x128xf32>
      %58 = vector.extract_strided_slice %56 {offsets = [1, 0], sizes = [1, 128], strides = [1, 1]} : vector<2x128xf32> to vector<1x128xf32>
      %cst_30 = arith.constant 1.000000e+00 : f32
      %59 = vector.broadcast %cst_30 : f32 to vector<1x128xf32>
      %60 = arith.addf %57, %59 : vector<1x128xf32>
      %cst_31 = arith.constant 7.500000e+00 : f32
      %61 = vector.broadcast %cst_31 : f32 to vector<1x128xf32>
      %62 = arith.mulf %60, %61 : vector<1x128xf32>
      %cst_32 = arith.constant 0.000000e+00 : f32
      %cst_33 = arith.constant 1.500000e+01 : f32
      %63 = vector.broadcast %cst_32 : f32 to vector<1x128xf32>
      %64 = arith.maximumf %63, %62 : vector<1x128xf32>
      %65 = vector.broadcast %cst_33 : f32 to vector<1x128xf32>
      %66 = arith.minimumf %65, %64 : vector<1x128xf32>
      %cst_34 = arith.constant 1.000000e+00 : f32
      %67 = vector.broadcast %cst_34 : f32 to vector<1x128xf32>
      %68 = arith.addf %58, %67 : vector<1x128xf32>
      %cst_35 = arith.constant 7.500000e+00 : f32
      %69 = vector.broadcast %cst_35 : f32 to vector<1x128xf32>
      %70 = arith.mulf %68, %69 : vector<1x128xf32>
      %cst_36 = arith.constant 0.000000e+00 : f32
      %cst_37 = arith.constant 1.500000e+01 : f32
      %71 = vector.broadcast %cst_36 : f32 to vector<1x128xf32>
      %72 = arith.maximumf %71, %70 : vector<1x128xf32>
      %73 = vector.broadcast %cst_37 : f32 to vector<1x128xf32>
      %74 = arith.minimumf %73, %72 : vector<1x128xf32>
      %75 = math.floor %66 : vector<1x128xf32>
      %76 = math.floor %74 : vector<1x128xf32>
      %77 = arith.subf %66, %75 : vector<1x128xf32>
      %78 = arith.subf %74, %76 : vector<1x128xf32>
      %79 = arith.fptosi %76 : vector<1x128xf32> to vector<1x128xi32>
      %c16_i32_38 = arith.constant 16 : i32
      %80 = vector.broadcast %c16_i32_38 : i32 to vector<1x128xi32>
      %81 = arith.muli %79, %80 : vector<1x128xi32>
      %82 = arith.fptosi %75 : vector<1x128xf32> to vector<1x128xi32>
      %83 = arith.addi %81, %82 : vector<1x128xi32>
      %c0_39 = arith.constant 0 : index
      %c0_40 = arith.constant 0 : index
      %84 = vector.load %arg9[%c0_39, %c0_40] : memref<1x128xi32, #tpu.memory_space<vmem>>, vector<1x128xi32>
      tpu.vector_store %arg9[%c0_39, %c0_40], %83 {strides = array<i32>} : memref<1x128xi32, #tpu.memory_space<vmem>>, vector<1x128xi32>,
      %cst_41 = arith.constant 1.000000e+00 : f32
      %85 = vector.broadcast %cst_41 : f32 to vector<1x128xf32>
      %86 = arith.subf %85, %77 : vector<1x128xf32>
      %cst_42 = arith.constant 1.000000e+00 : f32
      %87 = vector.broadcast %cst_42 : f32 to vector<1x128xf32>
      %88 = arith.subf %87, %78 : vector<1x128xf32>
      %89 = arith.mulf %86, %88 : vector<1x128xf32>
      %c0_43 = arith.constant 0 : index
      %c0_44 = arith.constant 0 : index
      %90 = vector.load %arg8[%c0_43, %c0_44] : memref<4x128xf32, #tpu.memory_space<vmem>>, vector<1x128xf32>
      tpu.vector_store %arg8[%c0_43, %c0_44], %89 {strides = array<i32>} : memref<4x128xf32, #tpu.memory_space<vmem>>, vector<1x128xf32>,
      %cst_45 = arith.constant 1.000000e+00 : f32
      %91 = vector.broadcast %cst_45 : f32 to vector<1x128xf32>
      %92 = arith.subf %91, %78 : vector<1x128xf32>
      %93 = arith.mulf %77, %92 : vector<1x128xf32>
      %c1_46 = arith.constant 1 : index
      %c0_47 = arith.constant 0 : index
      %94 = vector.load %arg8[%c1_46, %c0_47] : memref<4x128xf32, #tpu.memory_space<vmem>>, vector<1x128xf32>
      tpu.vector_store %arg8[%c1_46, %c0_47], %93 {strides = array<i32>} : memref<4x128xf32, #tpu.memory_space<vmem>>, vector<1x128xf32>,
      %cst_48 = arith.constant 1.000000e+00 : f32
      %95 = vector.broadcast %cst_48 : f32 to vector<1x128xf32>
      %96 = arith.subf %95, %77 : vector<1x128xf32>
      %97 = arith.mulf %96, %78 : vector<1x128xf32>
      %c2_49 = arith.constant 2 : index
      %c0_50 = arith.constant 0 : index
      %98 = vector.load %arg8[%c2_49, %c0_50] : memref<4x128xf32, #tpu.memory_space<vmem>>, vector<1x128xf32>
      tpu.vector_store %arg8[%c2_49, %c0_50], %97 {strides = array<i32>} : memref<4x128xf32, #tpu.memory_space<vmem>>, vector<1x128xf32>,
      %99 = arith.mulf %77, %78 : vector<1x128xf32>
      %c3_51 = arith.constant 3 : index
      %c0_52 = arith.constant 0 : index
      %100 = vector.load %arg8[%c3_51, %c0_52] : memref<4x128xf32, #tpu.memory_space<vmem>>, vector<1x128xf32>
      tpu.vector_store %arg8[%c3_51, %c0_52], %99 {strides = array<i32>} : memref<4x128xf32, #tpu.memory_space<vmem>>, vector<1x128xf32>,
    } else {
    }
    %3 = tpu.iota {dimensions = array<i32: 0>} : vector<128x128xi32>
    %c128_i32 = arith.constant 128 : i32
    %4 = arith.muli %arg2, %c128_i32 : i32
    %5 = vector.broadcast %4 : i32 to vector<128x128xi32>
    %6 = arith.addi %3, %5 : vector<128x128xi32>
    %c0 = arith.constant 0 : index
    %c0_1 = arith.constant 0 : index
    %7 = vector.load %arg9[%c0, %c0_1] : memref<1x128xi32, #tpu.memory_space<vmem>>, vector<1x128xi32>
    %8 = vector.broadcast %7 : vector<1x128xi32> to vector<128x128xi32>
    %9 = arith.subi %6, %8 : vector<128x128xi32>
    %c0_2 = arith.constant 0 : index
    %c0_3 = arith.constant 0 : index
    %10 = vector.load %arg8[%c0_2, %c0_3] : memref<4x128xf32, #tpu.memory_space<vmem>>, vector<1x128xf32>
    %c1 = arith.constant 1 : index
    %c0_4 = arith.constant 0 : index
    %11 = vector.load %arg8[%c1, %c0_4] : memref<4x128xf32, #tpu.memory_space<vmem>>, vector<1x128xf32>
    %c2 = arith.constant 2 : index
    %c0_5 = arith.constant 0 : index
    %12 = vector.load %arg8[%c2, %c0_5] : memref<4x128xf32, #tpu.memory_space<vmem>>, vector<1x128xf32>
    %c3 = arith.constant 3 : index
    %c0_6 = arith.constant 0 : index
    %13 = vector.load %arg8[%c3, %c0_6] : memref<4x128xf32, #tpu.memory_space<vmem>>, vector<1x128xf32>
    %c0_i32_7 = arith.constant 0 : i32
    %14 = vector.broadcast %c0_i32_7 : i32 to vector<128x128xi32>
    %15 = arith.cmpi eq, %9, %14 : vector<128x128xi32>
    %cst = arith.constant 0.000000e+00 : f32
    %16 = vector.shape_cast %10 : vector<1x128xf32> to vector<1x128xf32>
    %17 = vector.broadcast %16 : vector<1x128xf32> to vector<128x128xf32>
    %18 = vector.broadcast %cst : f32 to vector<128x128xf32>
    %19 = arith.select %15, %17, %18 : vector<128x128xi1>, vector<128x128xf32>
    %c1_i32 = arith.constant 1 : i32
    %20 = vector.broadcast %c1_i32 : i32 to vector<128x128xi32>
    %21 = arith.cmpi eq, %9, %20 : vector<128x128xi32>
    %cst_8 = arith.constant 0.000000e+00 : f32
    %22 = vector.shape_cast %11 : vector<1x128xf32> to vector<1x128xf32>
    %23 = vector.broadcast %22 : vector<1x128xf32> to vector<128x128xf32>
    %24 = vector.broadcast %cst_8 : f32 to vector<128x128xf32>
    %25 = arith.select %21, %23, %24 : vector<128x128xi1>, vector<128x128xf32>
    %26 = arith.addf %19, %25 : vector<128x128xf32>
    %c16_i32 = arith.constant 16 : i32
    %27 = vector.broadcast %c16_i32 : i32 to vector<128x128xi32>
    %28 = arith.cmpi eq, %9, %27 : vector<128x128xi32>
    %cst_9 = arith.constant 0.000000e+00 : f32
    %29 = vector.shape_cast %12 : vector<1x128xf32> to vector<1x128xf32>
    %30 = vector.broadcast %29 : vector<1x128xf32> to vector<128x128xf32>
    %31 = vector.broadcast %cst_9 : f32 to vector<128x128xf32>
    %32 = arith.select %28, %30, %31 : vector<128x128xi1>, vector<128x128xf32>
    %33 = arith.addf %26, %32 : vector<128x128xf32>
    %c17_i32 = arith.constant 17 : i32
    %34 = vector.broadcast %c17_i32 : i32 to vector<128x128xi32>
    %35 = arith.cmpi eq, %9, %34 : vector<128x128xi32>
    %cst_10 = arith.constant 0.000000e+00 : f32
    %36 = vector.shape_cast %13 : vector<1x128xf32> to vector<1x128xf32>
    %37 = vector.broadcast %36 : vector<1x128xf32> to vector<128x128xf32>
    %38 = vector.broadcast %cst_10 : f32 to vector<128x128xf32>
    %39 = arith.select %35, %37, %38 : vector<128x128xi1>, vector<128x128xf32>
    %40 = arith.addf %33, %39 : vector<128x128xf32>
    %c0_11 = arith.constant 0 : index
    %c0_12 = arith.constant 0 : index
    %41 = vector.load %arg7[%c0_11, %c0_12] : memref<4x128xf32, #tpu.memory_space<vmem>>, vector<4x128xf32>
    %c0_13 = arith.constant 0 : index
    %c0_14 = arith.constant 0 : index
    %c0_15 = arith.constant 0 : index
    %42 = vector.load %arg3[%c0_13, %c0_14, %c0_15] : memref<1x4x128xf32, #tpu.memory_space<vmem>>, vector<1x4x128xf32>
    %43 = vector.shape_cast %42 : vector<1x4x128xf32> to vector<4x128xf32>
    %cst_16 = arith.constant dense<0.000000e+00> : vector<4x128xf32>
    %44 = tpu.matmul %43, %40, %cst_16 {dimension_numbers = #tpu.dot_dimension_numbers<[1], [0], [0], [1], [0, 0, 1, 1], [], []>} : vector<4x128xf32>, vector<128x128xf32>, vector<4x128xf32> -> vector<4x128xf32>
    %45 = arith.addf %41, %44 : vector<4x128xf32>
    %c0_17 = arith.constant 0 : index
    %c0_18 = arith.constant 0 : index
    %46 = vector.load %arg7[%c0_17, %c0_18] : memref<4x128xf32, #tpu.memory_space<vmem>>, vector<4x128xf32>
    tpu.vector_store %arg7[%c0_17, %c0_18], %45 {strides = array<i32>} : memref<4x128xf32, #tpu.memory_space<vmem>>, vector<4x128xf32>,
    %c1_i32_19 = arith.constant 1 : i32
    %47 = arith.cmpi eq, %arg2, %c1_i32_19 : i32
    %48 = arith.extui %47 : i1 to i32
    %c0_i32_20 = arith.constant 0 : i32
    %49 = arith.cmpi ne, %48, %c0_i32_20 : i32
    scf.if %49 {
      %c0_21 = arith.constant 0 : index
      %c0_22 = arith.constant 0 : index
      %50 = vector.load %arg7[%c0_21, %c0_22] : memref<4x128xf32, #tpu.memory_space<vmem>>, vector<4x128xf32>
      %51 = vector.shape_cast %50 : vector<4x128xf32> to vector<1x4x128xf32>
      %c0_23 = arith.constant 0 : index
      %c0_24 = arith.constant 0 : index
      %c0_25 = arith.constant 0 : index
      %52 = vector.load %arg6[%c0_23, %c0_24, %c0_25] : memref<1x4x128xf32, #tpu.memory_space<vmem>>, vector<1x4x128xf32>
      tpu.vector_store %arg6[%c0_23, %c0_24, %c0_25], %51 {strides = array<i32>} : memref<1x4x128xf32, #tpu.memory_space<vmem>>, vector<1x4x128xf32>,
    } else {
    }
    return
  }
  func.func @transform_0(%arg0: i32, %arg1: i32, %arg2: i32) -> (i32, i32, i32) {
    %c0_i32 = arith.constant 0 : i32
    %c0_i32_0 = arith.constant 0 : i32
    return %arg0, %c0_i32, %arg2 : i32, i32, i32
  }
  func.func @transform_1(%arg0: i32, %arg1: i32, %arg2: i32) -> (i32, i32, i32) {
    %c0_i32 = arith.constant 0 : i32
    %c0_i32_0 = arith.constant 0 : i32
    return %arg0, %c0_i32, %arg1 : i32, i32, i32
  }
  func.func @transform_2(%arg0: i32, %arg1: i32, %arg2: i32) -> (i32, i32, i32) {
    %c0_i32 = arith.constant 0 : i32
    %c0_i32_0 = arith.constant 0 : i32
    return %arg0, %c0_i32, %arg1 : i32, i32, i32
  }
  func.func @transform_3(%arg0: i32, %arg1: i32, %arg2: i32) -> (i32, i32, i32) {
    %c0_i32 = arith.constant 0 : i32
    %c0_i32_0 = arith.constant 0 : i32
    return %arg0, %c0_i32, %arg1 : i32, i32, i32
  }
}

</mosaic_0001>

<bundles_post_ra>
// kernel: tpu_custom_call.1
= control target key start
LH: loop header
LB: loop body
LE: loop exit
PB: predicated region body
PF: predicated region fallthrough
CT: control target
= control target key end

     0   :  { %s1775_s0 = inlined_call_operand.hbm [shape: f32[2,4,256], index: 0, kind: input, shape index: {}]   ;;  %s1776_s1 = inlined_call_operand.hbm [shape: f32[2,2,256], index: 1, kind: input, shape index: {}]   ;;  %s1777_s2 = inlined_call_operand.hbm [shape: f32[2,2,256], index: 2, kind: input, shape index: {}]   ;;  %s1778_s3 = inlined_call_operand.hbm [shape: f32[2,4,256], index: 3, kind: output, shape index: {}]  }
   0x1   :  { %1797 = sst [smem:[#allocation26_spill]] %s1776_s1 }
   0x2   :  { %1798 = sst [smem:[#allocation27_spill]] %s1777_s2 }
   0x3   :  { %1799 = sst [smem:[#allocation28_spill]] %s1778_s3 }
   0x4   :  { %8 = vsyncpa [#allocation6], 0 }
   0x5   :  { %10 = vsyncpa [#allocation6 + $0x1], 0 }
   0x6   :  { %11 = vsyncpa [#allocation9], 0 }
   0x7   :  { %13 = vsyncpa [#allocation9 + $0x1], 0 }
   0x8   :  { %14 = vsyncpa [#allocation7], 0 }
   0x9   :  { %16 = vsyncpa [#allocation7 + $0x1], 0  ;;  %s1279_s12 = smov 0   ;;  %s1281_s13 = smov 0  }
   0xa   :  { %s1283_s14 = smov 0   ;;  %s1285_s15 = smov 0  }
   0xb   :  { %s1287_s16 = smov 0   ;;  %s1289_s17 = smov 0  }
   0xc   :  { %s1291_s18 = smov 0   ;;  %s1293_s19 = smov 0  }
   0xd   :  { %s1295_s20 = smov 0   ;;  %s1297_s21 = smov 0  }
   0xe   :  { %s1299_s22 = smov 0   ;;  %s1301_s23 = smov 0  }
   0xf   :  { %s1303_s24 = smov 0  }
  0x10 LB: > { %1800 = sst [smem:[#allocation15_spill]] %s1202_s12  ;;  %s1345_s25 = sadd.s32 4294967295, %s1250_s24   ;;  %s1250_s24 = sphi %s1303_s24, %s22_s24   ;;  %s1246_s23 = sphi %s1301_s23, %s1855_s23   ;;  %s1242_s22 = sphi %s1299_s22, %s1846_s22   ;;  %s1238_s21 = sphi %s1297_s21, %s1845_s21   ;;  %s1234_s20 = sphi %s1295_s20, %s1854_s20   ;;  %s1230_s19 = sphi %s1293_s19, %s1853_s19   ;;  %s1226_s18 = sphi %s1291_s18, %s1843_s18   ;;  %s1222_s17 = sphi %s1289_s17, %s1852_s17   ;;  %s1218_s16 = sphi %s1287_s16, %s1851_s16   ;;  %s1214_s15 = sphi %s1285_s15, %s1850_s15   ;;  %s1210_s14 = sphi %s1283_s14, %s1849_s14   ;;  %s1206_s13 = sphi %s1281_s13, %s1848_s13   ;;  %s1202_s12 = sphi %s1279_s12, %s1847_s12  }
  0x11   : > { %1801 = sst [smem:[#allocation16_spill]] %s1226_s18  ;;  %s811_s26 = sadd.s32 4294967294, %s1250_s24  }
  0x12   : > { %1802 = sst [smem:[#allocation17_spill]] %s1230_s19  ;;  %p1787_p0 = scmp.eq.s32.totalorder %s1250_s24, 0 }
  0x13   : > { %1803 = sst [smem:[#allocation18_spill]] %s1234_s20  ;;  %p1786_p1 = scmp.eq.s32.totalorder %s1345_s25, 0 }
  0x14   : > { %1804 = sst [smem:[#allocation19_spill]] %s1238_s21  ;;  %p85_p2 = scmp.ne.s32.totalorder %s1210_s14, %s1206_s13 }
  0x15   : > { %1805 = sst [smem:[#allocation20_spill]] %s1242_s22  ;;  %p91_p3 = scmp.ne.s32.totalorder %s1206_s13, %s1202_s12 }
  0x16   : > { %p145_p4 = scmp.eq.s32.totalorder %s1345_s25, 7  ;;  %p1360_p5 = por %p85_p2, %p1787_p0 }
  0x17   : > { %p151_p6 = scmp.eq.s32.totalorder %s811_s26, 7  ;;  %p1366_p7 = por %p91_p3, %p1786_p1 }
  0x18   : > { %p1370_p8 = por %p145_p4, %p85_p2  ;;  %p1785_p10 = scmp.lt.s32.totalorder %s1250_s24, 8 }
  0x19   : > { %s1807_s4 = scalar_select %p1366_p7, 1, 0 }
  0x1a   : > { %s1809_s5 = scalar_select %p1370_p8, 1, 0 }
  0x1b   : > { %1808 = sst [smem:[#allocation21_spill]] %s1807_s4  ;;  %p1374_p9 = por %p151_p6, %p91_p3 }
  0x1c   : > { %1810 = sst [smem:[#allocation22_spill]] %s1809_s5  ;;  %s1784_s7 = sshll.u32 %s1246_s23, 1 }
  0x1d   : > { %s1811_s6 = scalar_select %p1374_p9, 1, 0 }
  0x1e   : > { %s191_s8 = sand.u32 1, %s1250_s24   ;;  %s193_s9 = sand.u32 1, %s1210_s14  }
  0x1f   : > { %1812 = sst [smem:[#allocation23_spill]] %s1811_s6  ;;  %s1382_s10 = sshll.u32 %s193_s9, 1 }
  0x20   : > { %s200_s11 = sadd.s32 %s1242_s22, %s1784_s7  ;;  %s195_s29 = scalar_lea.vmem [#allocation8], %s1382_s10 }
  0x21   : > { %s819_s26 = sshll.u32 %s200_s11, 5  ;;  %s204_s28 = sshll.u32 %s195_s29, 4  ;;  %s205_s28 = int_to_ptr.vmem [resolvable:$true] %s204_s28 }
  0x22   : > { %s1813_s1 = sld [smem:[#allocation26_spill]]  ;;  %p1395_p11 = pnand %p1785_p10, %p1360_p5 }
  0x23   : > { %s1815_s2 = sld [smem:[#allocation27_spill]]  ;;  %p823_p12 = scmp.ge.s32.totalorder %s1250_s24, 1 }
  0x24   : > { %p229_p13 = scmp.lt.s32.totalorder %s1250_s24, 9  ;;  %s1406_s29 = scalar_lea.sflag [#allocation9], %s191_s8 }
  0x25   : > { %p1795_p2 = pneg %p1395_p11  ;;  %s1039_s12 = scalar_lea.vmem %s205_s28, 32 }
  0x26   : > { %p1040_p3 = scmp.ne.s32.totalorder %s205_s28, %s1039_s12  ;;  %s1252_s27 = smov [#allocation8]  }
  0x27   : > { %s1044_s30 = sshll.u32 %s1252_s27, 4  ;;  %s1045_s30 = int_to_ptr.vmem [resolvable:$false] %s1044_s30 }
  0x28   : > { %s202_s3 = scalar_lea.hbm %s1813_s1, %s819_s26  ;;  %p1042_p4 = pnand %p1040_p3, %p1795_p2 }
  0x29   : > { %s1402_s7 = scalar_lea.hbm %s1815_s2, %s819_s26  ;;  %s1046_s5 = scalar_lea.vmem %s1045_s30, 64 }
  0x2a   : > { %p1043_p5 = pneg %p1042_p4  ;;  %p1047_p6 = scmp.lt.s32.totalorder %s205_s28, %s1045_s30 }
  0x2b   : > { %p1048_p10 = scmp.lt.s32.totalorder %s1046_s5, %s1039_s12 }
  0x2d   : > { %p1049_p1 = por %p1048_p10, %p1047_p6 }
  0x2f   : > { %p1050_p0 = pnand %p1049_p1, %p1043_p5 }
  0x31   : > { %1053 = shalt.err (!%p1050_p0)
}
  0x32   : > { %909 = dma.hbm_to_vmem [thread:$0]  (!%p1395_p11), %s202_s3, 32, %s205_s28, %s1406_s29  }
  0x33   : > { %p1420_p0 = pnand %p823_p12, %p229_p13  ;;  %s34_s11 = sadd.s32 1, %s1238_s21 }
  0x34   : > { %p35_p1 = scmp.ge.s32.totalorder %s34_s11, 2  ;;  %p57_p10 = scmp.ne.s32.totalorder %s1222_s17, %s1218_s16 }
  0x35   : > { %p63_p3 = scmp.ne.s32.totalorder %s1218_s16, %s1214_s15  ;;  %s1818_s9 = sadd.s32 1, %s1242_s22 }
  0x36   : > { %s1857_s11 = smov (%p35_p1, %s34_s11), 0  ;;  %s1859_s9 = smov (!%p35_p1, %s1818_s9), %s1242_s22 }
  0x37   : > { %1817 = sst [smem:[#allocation24_spill]] %s1857_s11  ;;  %s46_s3 = ssub.s32 %s1238_s21, %s1857_s11 }
  0x38   : > { %p1819_p4 = scmp.eq.s32.totalorder %s1250_s24, 0  ;;  %p39_p12 = scmp.ge.s32.totalorder %s1859_s9, 2 }
  0x39   : > { %p1821_p13 = scmp.eq.s32.totalorder %s1345_s25, 0  ;;  %s171_s27 = sand.u32 1, %s1222_s17  }
  0x3a   : > { %p1439_p5 = por %p1819_p4, %p57_p10  ;;  %s1823_s15 = sshll.u32 %s1246_s23, 1 }
  0x3b   : > { %p1445_p6 = por %p1821_p13, %p63_p3  ;;  %s180_s30 = sadd.s32 %s1238_s21, %s1823_s15 }
  0x3c   : > { %s1861_s9 = smov (%p39_p12, %s1859_s9), 0  ;;  %s1825_s5 = sadd.s32 1, %s1246_s23 }
  0x3d   : > { %1824 = sst [smem:[#allocation25_spill]] %s1861_s9  ;;  %s1863_s5 = smov (!%p39_p12, %s1825_s5), %s1246_s23 }
  0x3e   : > { %s74_s26 = ssub.s32 %s1242_s22, %s1861_s9  ;;  %p43_p1 = scmp.ge.s32.totalorder %s1863_s5, 2 }
  0x3f   : > { %s814_s1 = sshll.u32 %s171_s27, 2  ;;  %s816_s2 = sshll.u32 %s180_s30, 6 }
  0x40   : > { %s1865_s5 = smov (%p43_p1, %s1863_s5), 0  ;;  %s1465_s21 = scalar_lea.hbm %s1775_s0, %s816_s2 }
  0x41   : > { %s175_s19 = scalar_lea.vmem [#allocation5], %s814_s1  ;;  %s45_s18 = ssub.s32 %s1246_s23, %s1865_s5 }
  0x42   : > { %s184_s20 = sshll.u32 %s175_s19, 4  ;;  %s47_s9 = sor.u32 %s46_s3, %s45_s18  ;;  %s185_s20 = int_to_ptr.vmem [resolvable:$true] %s184_s20 }
  0x43   : > { %s75_s22 = sor.u32 %s74_s26, %s45_s18  ;;  %p48_p10 = scmp.eq.s32.totalorder %s47_s9, 0 }
  0x44   : > { %p76_p3 = scmp.eq.s32.totalorder %s75_s22, 0  ;;  %p1826_p4 = scmp.lt.s32.totalorder %s1250_s24, 8 }
  0x45   : > { %s215_s4 = scalar_lea.vmem [#allocation10], %s1382_s10  ;;  %s1828_s15 = sadd.s32 1, %s1222_s17 }
  0x46   : > { %p1473_p12 = pnand %p1826_p4, %p1439_p5  ;;  %s224_s11 = sshll.u32 %s215_s4, 4  ;;  %s1488_s11 = int_to_ptr.vmem [resolvable:$true] %s224_s11 }
  0x47   : > { %s1481_s2 = scalar_select %p48_p10, %s1222_s17, %s1828_s15  }
  0x48   : > { %s1829_s1 = sadd.s32 1, %s1210_s14  ;;  %s172_s18 = scalar_lea.sflag [#allocation6], %s171_s27 }
  0x49   : > { %s1486_s19 = scalar_select %p76_p3, %s1210_s14, %s1829_s1  }
  0x4a   : > { %p1056_p13 = pneg %p1473_p12  ;;  %s1067_s22 = scalar_lea.vmem %s185_s20, 64 }
  0x4b   : > { %p1068_p1 = scmp.ne.s32.totalorder %s185_s20, %s1067_s22  ;;  %s1253_s26 = smov [#allocation5]  }
  0x4c   : > { %s1072_s9 = sshll.u32 %s1253_s26, 4  ;;  %s1073_s9 = int_to_ptr.vmem [resolvable:$false] %s1072_s9 }
  0x4d   : > { %p1070_p5 = pnand %p1068_p1, %p1056_p13  ;;  %s1074_s10 = scalar_lea.vmem %s1073_s9, 128 }
  0x4e   : > { %p1075_p2 = scmp.lt.s32.totalorder %s185_s20, %s1073_s9  ;;  %p1076_p9 = scmp.lt.s32.totalorder %s1074_s10, %s1067_s22 }
  0x4f   : > { %p1071_p4 = pneg %p1070_p5 }
  0x50   : > { %p1077_p10 = por %p1076_p9, %p1075_p2 }
  0x52   : > { %p1078_p8 = pnand %p1077_p10, %p1071_p4 }
  0x54   : > { %1081 = shalt.err (!%p1078_p8)
}
  0x55   : > { %906 = dma.hbm_to_vmem [thread:$0]  (!%p1473_p12), %s1465_s21, 64, %s185_s20, %s172_s18  }
  0x56   : > { %s1095_s4 = scalar_lea.vmem %s1488_s11, 32  ;;  %p1830_p13 = pneg %p1395_p11 }
  0x57   : > { %p1096_p3 = scmp.ne.s32.totalorder %s1488_s11, %s1095_s4  ;;  %s1254_s3 = smov [#allocation10]  }
  0x58   : > { %s1100_s28 = sshll.u32 %s1254_s3, 4  ;;  %s1101_s28 = int_to_ptr.vmem [resolvable:$false] %s1100_s28 }
  0x59   : > { %p1098_p1 = pnand %p1096_p3, %p1830_p13  ;;  %s1102_s27 = scalar_lea.vmem %s1101_s28, 64 }
  0x5a   : > { %p1103_p9 = scmp.lt.s32.totalorder %s1488_s11, %s1101_s28  ;;  %p1104_p8 = scmp.lt.s32.totalorder %s1102_s27, %s1095_s4 }
  0x5b   : > { %p1099_p5 = pneg %p1098_p1 }
  0x5c   : > { %p1105_p2 = por %p1104_p8, %p1103_p9 }
  0x5e   : > { %p1106_p4 = pnand %p1105_p2, %p1099_p5 }
  0x60   : > { %1109 = shalt.err (!%p1106_p4)
}
  0x61   : > { %912 = dma.hbm_to_vmem [thread:$0]  (!%p1395_p11), %s1402_s7, 32, %s1488_s11, %s1406_s29  }
  0x62   : > { %233 = sbr.rel (%p1420_p0) target bundleno = 444 (0x1bc), region = 32  ;;  %s235_s20 = sand.u32 (!%p1420_p0), 1, %s1218_s16  }
  0x63   : > { %s1509_s21 = sshll.u32 (!%p1420_p0), %s235_s20, 2  ;;  %s236_s30 = scalar_lea.sflag (!%p1420_p0), [#allocation6], %s235_s20 }
  0x64   : > { %s239_s15 = scalar_lea.vmem (!%p1420_p0), [#allocation5], %s1509_s21 }
  0x67   : > { %1189 = dma.done.wait (%p1445_p6), %s236_s30, 64  }
  0x68   : > { %1191 = vsyncadd (%p1445_p6), %s236_s30, 4294967232  ;;  %s244_s7 = sand.u32 1, %s1345_s25   ;;  %s1518_s29 = sand.u32 1, %s1206_s13  }
  0x69   : > { %s825_s8 = sshll.u32 %s1518_s29, 1  ;;  %s245_s11 = scalar_lea.sflag [#allocation9], %s244_s7 }
  0x6a   : > { %s248_s1 = scalar_lea.vmem [#allocation8], %s825_s8 }
  0x6b   : > { %1193 = dma.done.wait (%p1366_p7), %s245_s11, 64  }
  0x6c   : > { %1195 = vsyncadd (%p1366_p7), %s245_s11, 4294967232  ;;  %s827_s18 = sshll.u32 %s1518_s29, 2  ;;  %s257_s22 = scalar_lea.vmem [#allocation10], %s825_s8 }
  0x6d   : > { %s1526_s12 = scalar_lea.vmem [#allocation11], %s827_s18  ;;  %s1832_s26 = sld [smem:[#allocation16_spill]] }
  0x73   : > { %p828_p11 = scmp.ne.s32.totalorder %s1832_s26, 0 }
  0x75   : > { %293 = sbr.rel (%p828_p11) target bundleno = 145 (0x91), region = 48 }
  0x7a   : > { %v295_v0 = vld [vmem:[%s248_s1] sm:$0x3]  ;;  %v296_v1 = vld [vmem:[%s257_s22] sm:$0x3]  ;;  %v1255_v2 = vmov 0.0  }
  0x7b   : > { %294 = vst [vmem:[#allocation2] sm:$0xf] %v1255_v2  ;;  %v297_v3 = vadd.f32 %v296_v1, %v295_v0 }
  0x7d   : > { %v298_v4 = vadd.f32 1.0, %v297_v3 }
  0x7f   : > { %v299_v5 = vmul.f32 7.5, %v298_v4 }
  0x81   : > { %v300_v6 = vmax.f32 %v299_v5, 0.0 }
  0x83   : > { %v301_v7 = vmin.f32 %v300_v6, 15.0 }
  0x85   : > { %v302_v8 = vfloor.f32 %v301_v7 }
  0x87   : > { %v303_v9 = vsub.f32 %v301_v7, %v302_v8  ;;  %v893_v10 = vtrunc.f32 %v302_v8 }
  0x89   : > { %v894_v11 = vcvt.f32.s32 %v893_v10  ;;  %v309_v12 = vsub.f32 1.0, %v303_v9  ;;  %v318_v13 = vrot.slane %v303_v9, 1 }
  0x8b   : > { %v305_v14 = vmul.u32 16, %v894_v11  ;;  %v306_v15 = vrot.slane %v894_v11, 7  ;;  %v311_v16 = vrot.slane %v309_v12, 1  ;;  %v320_v17 = vmul.f32 %v318_v13, %v309_v12 }
  0x8c   : > { %v322_v18 = vmul.f32 %v318_v13, %v303_v9 }
  0x8d   : > { %v307_v19 = vadd.s32 %v306_v15, %v305_v14  ;;  %v313_v20 = vmul.f32 %v311_v16, %v309_v12  ;;  %v315_v21 = vmul.f32 %v311_v16, %v303_v9  ;;  %321 = vst [vmem:[#allocation3 + $0x2] sm:$0x1] %v320_v17 }
  0x8e   : > { %323 = vst [vmem:[#allocation3 + $0x3] sm:$0x1] %v322_v18 }
  0x8f   : > { %308 = vst [vmem:[#allocation4 - $0x1] sm:$0x2] %v307_v19  ;;  %314 = vst [vmem:[#allocation3] sm:$0x1] %v313_v20 }
  0x90   : > { %316 = vst [vmem:[#allocation3 + $0x1] sm:$0x1] %v315_v21 }
  0x91 PF: > { %v324_v22 = vlaneseq  ;;  %s1833_s25 = sld [smem:[#allocation16_spill]]  ;;  %v1256_v23 = vmov 0.0   ;;  %vm1257_vm0 = vmmov 0  }
  0x92   : > { %858 = vmatprep.subr.mxu0 %v1256_v23  ;;  %890 = vmatprep.mubr.msk.f32.mxu0 %vm1257_vm0, %v1256_v23 }
  0x93   : > { %v1531_v24 = vshrl.u32 %v324_v22, 7 }
  0x94   : > { %v1559_v46 = vld [vmem:[#allocation3 + $0x2] ss:$0 sm:$0xff] }
  0x95   : > { %v340_v26 = vadd.s32 120, %v1531_v24  ;;  %v339_v27 = vadd.s32 112, %v1531_v24  ;;  %v338_v28 = vadd.s32 104, %v1531_v24  ;;  %v337_v29 = vadd.s32 96, %v1531_v24  ;;  %v1561_v47 = vld [vmem:[#allocation3 + $0x3] ss:$0 sm:$0xff] }
  0x96   : > { %v1540_v30 = vld [vmem:[#allocation4] ss:$0 sm:$0xff]  ;;  %v336_v31 = vadd.s32 88, %v1531_v24  ;;  %v335_v32 = vadd.s32 80, %v1531_v24  ;;  %v334_v33 = vadd.s32 72, %v1531_v24  ;;  %v333_v34 = vadd.s32 64, %v1531_v24 }
  0x97   : > { %s829_s9 = sshll.u32 %s1833_s25, 7  ;;  %v1550_v39 = vld [vmem:[#allocation3] ss:$0 sm:$0xff]  ;;  %v1557_v45 = vld [vmem:[#allocation3 + $0x1] ss:$0 sm:$0xff]  ;;  %p835_p7 = scmp.ne.s32.totalorder %s1833_s25, 1 }
  0x98   : > { %v1533_v25 = vstv %s829_s9 }
  0x99   : > { %v358_v35 = vadd.s32 %v1533_v25, %v340_v26  ;;  %v357_v36 = vadd.s32 %v1533_v25, %v339_v27  ;;  %v356_v37 = vadd.s32 %v1533_v25, %v338_v28  ;;  %v355_v38 = vadd.s32 %v1533_v25, %v337_v29 }
  0x9a   : > { %v354_v40 = vadd.s32 %v1533_v25, %v336_v31  ;;  %v353_v41 = vadd.s32 %v1533_v25, %v335_v32  ;;  %v352_v42 = vadd.s32 %v1533_v25, %v334_v33  ;;  %v351_v43 = vadd.s32 %v1533_v25, %v333_v34 }
  0x9b   : > { %v379_v44 = vsub.s32 %v358_v35, %v1540_v30  ;;  %v378_v48 = vsub.s32 %v357_v36, %v1540_v30  ;;  %v377_v49 = vsub.s32 %v356_v37, %v1540_v30  ;;  %v376_v50 = vsub.s32 %v355_v38, %v1540_v30 }
  0x9c   : > { %v1567_v51 = vsub.s32 %v354_v40, %v1540_v30  ;;  %v1570_v52 = vsub.s32 %v353_v41, %v1540_v30  ;;  %v1573_v53 = vsub.s32 %v352_v42, %v1540_v30  ;;  %v1576_v54 = vsub.s32 %v351_v43, %v1540_v30 }
  0x9d   : > { %vm399_vm1 = vcmp.eq.s32.totalorder %v379_v44, 0  ;;  %vm435_vm2 = vcmp.eq.s32.totalorder %v379_v44, 1  ;;  %vm487_vm3 = vcmp.eq.s32.totalorder %v379_v44, 16  ;;  %vm539_vm4 = vcmp.eq.s32.totalorder %v379_v44, 17 }
  0x9e   : > { %v419_v55 = vsel %vm399_vm1, %v1550_v39, 0.0  ;;  %v455_v56 = vsel %vm435_vm2, %v1557_v45, 0.0  ;;  %v507_v57 = vsel %vm487_vm3, %v1559_v46, 0.0  ;;  %v559_v58 = vsel %vm539_vm4, %v1561_v47, 0.0 }
  0x9f   : > { %v471_v59 = vadd.f32 %v455_v56, %v419_v55  ;;  %vm398_vm5 = vcmp.eq.s32.totalorder %v378_v48, 0  ;;  %vm434_vm6 = vcmp.eq.s32.totalorder %v378_v48, 1  ;;  %vm486_vm7 = vcmp.eq.s32.totalorder %v378_v48, 16 }
  0xa0   : > { %v418_v60 = vsel %vm398_vm5, %v1550_v39, 0.0  ;;  %v454_v61 = vsel %vm434_vm6, %v1557_v45, 0.0  ;;  %v506_v62 = vsel %vm486_vm7, %v1559_v46, 0.0  ;;  %vm538_vm8 = vcmp.eq.s32.totalorder %v378_v48, 17 }
  0xa1   : > { %v523_v63 = vadd.f32 %v507_v57, %v471_v59  ;;  %v470_v0 = vadd.f32 %v454_v61, %v418_v60  ;;  %v558_v1 = vsel %vm538_vm8, %v1561_v47, 0.0  ;;  %vm397_vm9 = vcmp.eq.s32.totalorder %v377_v49, 0 }
  0xa2   : > { %v417_v2 = vsel %vm397_vm9, %v1550_v39, 0.0  ;;  %vm433_vm10 = vcmp.eq.s32.totalorder %v377_v49, 1  ;;  %vm485_vm11 = vcmp.eq.s32.totalorder %v377_v49, 16  ;;  %vm537_vm12 = vcmp.eq.s32.totalorder %v377_v49, 17 }
  0xa3   : > { %v575_v3 = vadd.f32 %v559_v58, %v523_v63  ;;  %v522_v4 = vadd.f32 %v506_v62, %v470_v0  ;;  %v453_v5 = vsel %vm433_vm10, %v1557_v45, 0.0  ;;  %v505_v6 = vsel %vm485_vm11, %v1559_v46, 0.0 }
  0xa4   : > { %v469_v7 = vadd.f32 %v453_v5, %v417_v2  ;;  %v557_v8 = vsel %vm537_vm12, %v1561_v47, 0.0  ;;  %vm396_vm13 = vcmp.eq.s32.totalorder %v376_v50, 0  ;;  %vm432_vm14 = vcmp.eq.s32.totalorder %v376_v50, 1 }
  0xa5   : > { %859 = vmatpush3.msra.mxu0 %v575_v3  ;;  %v574_v9 = vadd.f32 %v558_v1, %v522_v4  ;;  %v416_v10 = vsel %vm396_vm13, %v1550_v39, 0.0  ;;  %v452_v11 = vsel %vm432_vm14, %v1557_v45, 0.0  ;;  %vm484_vm15 = vcmp.eq.s32.totalorder %v376_v50, 16 }
  0xa6   : > { %860 = vmatprep.subr.mxu0 %v1256_v23  ;;  %v521_v12 = vadd.f32 %v505_v6, %v469_v7  ;;  %v468_v13 = vadd.f32 %v452_v11, %v416_v10  ;;  %v504_v14 = vsel %vm484_vm15, %v1559_v46, 0.0  ;;  %vm536_vm0 = vcmp.eq.s32.totalorder %v376_v50, 17 }
  0xa7   : > { %861 = vmatpush3.msra.mxu0 %v574_v9  ;;  %v556_v15 = vsel %vm536_vm0, %v1561_v47, 0.0  ;;  %vm395_vm1 = vcmp.eq.s32.totalorder %v1567_v51, 0  ;;  %vm431_vm2 = vcmp.eq.s32.totalorder %v1567_v51, 1  ;;  %vm483_vm3 = vcmp.eq.s32.totalorder %v1567_v51, 16 }
  0xa8   : > { %862 = vmatprep.subr.mxu0 %v1256_v23  ;;  %v573_v16 = vadd.f32 %v557_v8, %v521_v12  ;;  %v520_v17 = vadd.f32 %v504_v14, %v468_v13  ;;  %v415_v18 = vsel %vm395_vm1, %v1550_v39, 0.0  ;;  %v451_v19 = vsel %vm431_vm2, %v1557_v45, 0.0 }
  0xa9   : > { %v467_v20 = vadd.f32 %v451_v19, %v415_v18  ;;  %v503_v21 = vsel %vm483_vm3, %v1559_v46, 0.0  ;;  %vm535_vm4 = vcmp.eq.s32.totalorder %v1567_v51, 17  ;;  %vm394_vm5 = vcmp.eq.s32.totalorder %v1570_v52, 0 }
  0xaa   : > { %863 = vmatpush3.msra.mxu0 %v573_v16  ;;  %v572_v22 = vadd.f32 %v556_v15, %v520_v17  ;;  %v555_v26 = vsel %vm535_vm4, %v1561_v47, 0.0  ;;  %v414_v27 = vsel %vm394_vm5, %v1550_v39, 0.0  ;;  %vm430_vm6 = vcmp.eq.s32.totalorder %v1570_v52, 1 }
  0xab   : > { %864 = vmatprep.subr.mxu0 %v1256_v23  ;;  %v519_v28 = vadd.f32 %v503_v21, %v467_v20  ;;  %v450_v29 = vsel %vm430_vm6, %v1557_v45, 0.0  ;;  %vm482_vm7 = vcmp.eq.s32.totalorder %v1570_v52, 16  ;;  %vm534_vm8 = vcmp.eq.s32.totalorder %v1570_v52, 17 }
  0xac   : > { %865 = vmatpush3.msra.mxu0 %v572_v22  ;;  %v466_v31 = vadd.f32 %v450_v29, %v414_v27  ;;  %v502_v32 = vsel %vm482_vm7, %v1559_v46, 0.0  ;;  %v554_v33 = vsel %vm534_vm8, %v1561_v47, 0.0  ;;  %vm393_vm9 = vcmp.eq.s32.totalorder %v1573_v53, 0 }
  0xad   : > { %866 = vmatprep.subr.mxu0 %v1256_v23  ;;  %v571_v34 = vadd.f32 %v555_v26, %v519_v28  ;;  %v413_v35 = vsel %vm393_vm9, %v1550_v39, 0.0  ;;  %vm429_vm10 = vcmp.eq.s32.totalorder %v1573_v53, 1  ;;  %vm481_vm11 = vcmp.eq.s32.totalorder %v1573_v53, 16 }
  0xae   : > { %v518_v36 = vadd.f32 %v502_v32, %v466_v31  ;;  %v449_v37 = vsel %vm429_vm10, %v1557_v45, 0.0  ;;  %v501_v38 = vsel %vm481_vm11, %v1559_v46, 0.0  ;;  %vm533_vm12 = vcmp.eq.s32.totalorder %v1573_v53, 17 }
  0xaf   : > { %867 = vmatpush3.msra.mxu0 %v571_v34  ;;  %v465_v40 = vadd.f32 %v449_v37, %v413_v35  ;;  %v553_v41 = vsel %vm533_vm12, %v1561_v47, 0.0  ;;  %vm392_vm13 = vcmp.eq.s32.totalorder %v1576_v54, 0  ;;  %vm428_vm14 = vcmp.eq.s32.totalorder %v1576_v54, 1 }
  0xb0   : > { %868 = vmatprep.subr.mxu0 %v1256_v23  ;;  %v570_v42 = vadd.f32 %v554_v33, %v518_v36  ;;  %v412_v43 = vsel %vm392_vm13, %v1550_v39, 0.0  ;;  %v448_v44 = vsel %vm428_vm14, %v1557_v45, 0.0  ;;  %vm480_vm15 = vcmp.eq.s32.totalorder %v1576_v54, 16 }
  0xb1   : > { %v517_v48 = vadd.f32 %v501_v38, %v465_v40  ;;  %v464_v49 = vadd.f32 %v448_v44, %v412_v43  ;;  %v500_v50 = vsel %vm480_vm15, %v1559_v46, 0.0  ;;  %vm532_vm0 = vcmp.eq.s32.totalorder %v1576_v54, 17 }
  0xb2   : > { %869 = vmatpush3.msra.mxu0 %v570_v42  ;;  %v552_v51 = vsel %vm532_vm0, %v1561_v47, 0.0  ;;  %v332_v52 = vadd.s32 56, %v1531_v24  ;;  %v331_v53 = vadd.s32 48, %v1531_v24  ;;  %v330_v55 = vadd.s32 40, %v1531_v24 }
  0xb3   : > { %870 = vmatprep.subr.mxu0 %v1256_v23  ;;  %v569_v56 = vadd.f32 %v553_v41, %v517_v48  ;;  %v516_v57 = vadd.f32 %v500_v50, %v464_v49  ;;  %v329_v58 = vadd.s32 32, %v1531_v24  ;;  %v328_v59 = vadd.s32 24, %v1531_v24 }
  0xb4   : > { %v350_v60 = vadd.s32 %v1533_v25, %v332_v52  ;;  %v349_v54 = vadd.s32 %v1533_v25, %v331_v53  ;;  %v348_v61 = vadd.s32 %v1533_v25, %v330_v55  ;;  %v327_v62 = vadd.s32 16, %v1531_v24 }
  0xb5   : > { %871 = vmatpush3.msra.mxu0 %v569_v56  ;;  %v568_v63 = vadd.f32 %v552_v51, %v516_v57  ;;  %v347_v0 = vadd.s32 %v1533_v25, %v329_v58  ;;  %v346_v1 = vadd.s32 %v1533_v25, %v328_v59  ;;  %v326_v2 = vadd.s32 8, %v1531_v24 }
  0xb6   : > { %872 = vmatprep.subr.mxu0 %v1256_v23  ;;  %v371_v3 = vsub.s32 %v350_v60, %v1540_v30  ;;  %v370_v4 = vsub.s32 %v349_v54, %v1540_v30  ;;  %v369_v5 = vsub.s32 %v348_v61, %v1540_v30  ;;  %v345_v6 = vadd.s32 %v1533_v25, %v327_v62 }
  0xb7   : > { %873 = vmatpush3.msra.mxu0 %v568_v63  ;;  %v368_v7 = vsub.s32 %v347_v0, %v1540_v30  ;;  %v1651_v8 = vsub.s32 %v346_v1, %v1540_v30  ;;  %v344_v9 = vadd.s32 %v1533_v25, %v326_v2  ;;  %v343_v10 = vadd.s32 %v1533_v25, %v1531_v24 }
  0xb8   : > { %874 = vmatprep.subr.mxu0 %v1256_v23  ;;  %vm391_vm1 = vcmp.eq.s32.totalorder %v371_v3, 0  ;;  %vm427_vm2 = vcmp.eq.s32.totalorder %v371_v3, 1  ;;  %vm479_vm3 = vcmp.eq.s32.totalorder %v371_v3, 16  ;;  %vm531_vm4 = vcmp.eq.s32.totalorder %v371_v3, 17 }
  0xb9   : > { %v411_v11 = vsel %vm391_vm1, %v1550_v39, 0.0  ;;  %v447_v12 = vsel %vm427_vm2, %v1557_v45, 0.0  ;;  %v499_v13 = vsel %vm479_vm3, %v1559_v46, 0.0  ;;  %v551_v14 = vsel %vm531_vm4, %v1561_v47, 0.0 }
  0xba   : > { %v463_v15 = vadd.f32 %v447_v12, %v411_v11  ;;  %vm390_vm5 = vcmp.eq.s32.totalorder %v370_v4, 0  ;;  %vm426_vm6 = vcmp.eq.s32.totalorder %v370_v4, 1  ;;  %vm478_vm7 = vcmp.eq.s32.totalorder %v370_v4, 16  ;;  %v577_v11 = vld [vmem:[%s239_s15] sm:$0xf] }
  0xbb   : > { %v410_v24 = vsel %vm390_vm5, %v1550_v39, 0.0  ;;  %v446_v25 = vsel %vm426_vm6, %v1557_v45, 0.0  ;;  %v498_v16 = vsel %vm478_vm7, %v1559_v46, 0.0  ;;  %vm530_vm8 = vcmp.eq.s32.totalorder %v370_v4, 17 }
  0xbc   : > { %v515_v17 = vadd.f32 %v499_v13, %v463_v15  ;;  %v462_v18 = vadd.f32 %v446_v25, %v410_v24  ;;  %v550_v19 = vsel %vm530_vm8, %v1561_v47, 0.0  ;;  %vm389_vm9 = vcmp.eq.s32.totalorder %v369_v5, 0 }
  0xbd   : > { %v409_v20 = vsel %vm389_vm9, %v1550_v39, 0.0  ;;  %vm425_vm10 = vcmp.eq.s32.totalorder %v369_v5, 1  ;;  %vm477_vm11 = vcmp.eq.s32.totalorder %v369_v5, 16  ;;  %vm529_vm12 = vcmp.eq.s32.totalorder %v369_v5, 17 }
  0xbe   : > { %v567_v21 = vadd.f32 %v551_v14, %v515_v17  ;;  %v514_v22 = vadd.f32 %v498_v16, %v462_v18  ;;  %v445_v26 = vsel %vm425_vm10, %v1557_v45, 0.0  ;;  %v497_v27 = vsel %vm477_vm11, %v1559_v46, 0.0 }
  0xbf   : > { %v461_v28 = vadd.f32 %v445_v26, %v409_v20  ;;  %v549_v29 = vsel %vm529_vm12, %v1561_v47, 0.0  ;;  %vm388_vm13 = vcmp.eq.s32.totalorder %v368_v7, 0  ;;  %vm424_vm14 = vcmp.eq.s32.totalorder %v368_v7, 1 }
  0xc0   : > { %875 = vmatpush3.msra.mxu0 %v567_v21  ;;  %v566_v31 = vadd.f32 %v550_v19, %v514_v22  ;;  %v408_v32 = vsel %vm388_vm13, %v1550_v39, 0.0  ;;  %v444_v33 = vsel %vm424_vm14, %v1557_v45, 0.0  ;;  %vm476_vm15 = vcmp.eq.s32.totalorder %v368_v7, 16 }
  0xc1   : > { %876 = vmatprep.subr.mxu0 %v1256_v23  ;;  %v513_v34 = vadd.f32 %v497_v27, %v461_v28  ;;  %v460_v35 = vadd.f32 %v444_v33, %v408_v32  ;;  %v496_v36 = vsel %vm476_vm15, %v1559_v46, 0.0  ;;  %vm528_vm0 = vcmp.eq.s32.totalorder %v368_v7, 17 }
  0xc2   : > { %877 = vmatpush3.msra.mxu0 %v566_v31  ;;  %v548_v37 = vsel %vm528_vm0, %v1561_v47, 0.0  ;;  %vm387_vm1 = vcmp.eq.s32.totalorder %v1651_v8, 0  ;;  %vm423_vm2 = vcmp.eq.s32.totalorder %v1651_v8, 1  ;;  %vm475_vm3 = vcmp.eq.s32.totalorder %v1651_v8, 16 }
  0xc3   : > { %878 = vmatprep.subr.mxu0 %v1256_v23  ;;  %v565_v38 = vadd.f32 %v549_v29, %v513_v34  ;;  %v512_v40 = vadd.f32 %v496_v36, %v460_v35  ;;  %v407_v41 = vsel %vm387_vm1, %v1550_v39, 0.0  ;;  %v443_v42 = vsel %vm423_vm2, %v1557_v45, 0.0 }
  0xc4   : > { %v459_v43 = vadd.f32 %v443_v42, %v407_v41  ;;  %v495_v44 = vsel %vm475_vm3, %v1559_v46, 0.0  ;;  %vm527_vm4 = vcmp.eq.s32.totalorder %v1651_v8, 17  ;;  %v366_v48 = vsub.s32 %v345_v6, %v1540_v30 }
  0xc5   : > { %879 = vmatpush3.msra.mxu0 %v565_v38  ;;  %v564_v49 = vadd.f32 %v548_v37, %v512_v40  ;;  %v547_v50 = vsel %vm527_vm4, %v1561_v47, 0.0  ;;  %v365_v51 = vsub.s32 %v344_v9, %v1540_v30  ;;  %v364_v52 = vsub.s32 %v343_v10, %v1540_v30 }
  0xc6   : > { %880 = vmatprep.subr.mxu0 %v1256_v23  ;;  %v511_v53 = vadd.f32 %v495_v44, %v459_v43  ;;  %vm386_vm5 = vcmp.eq.s32.totalorder %v366_v48, 0  ;;  %vm422_vm6 = vcmp.eq.s32.totalorder %v366_v48, 1  ;;  %vm474_vm7 = vcmp.eq.s32.totalorder %v366_v48, 16 }
  0xc7   : > { %881 = vmatpush3.msra.mxu0 %v564_v49  ;;  %v406_v55 = vsel %vm386_vm5, %v1550_v39, 0.0  ;;  %v442_v56 = vsel %vm422_vm6, %v1557_v45, 0.0  ;;  %v494_v57 = vsel %vm474_vm7, %v1559_v46, 0.0  ;;  %vm526_vm8 = vcmp.eq.s32.totalorder %v366_v48, 17 }
  0xc8   : > { %882 = vmatprep.subr.mxu0 %v1256_v23  ;;  %v563_v58 = vadd.f32 %v547_v50, %v511_v53  ;;  %v458_v59 = vadd.f32 %v442_v56, %v406_v55  ;;  %v546_v30 = vsel %vm526_vm8, %v1561_v47, 0.0  ;;  %vm385_vm9 = vcmp.eq.s32.totalorder %v365_v51, 0 }
  0xc9   : > { %v405_v60 = vsel %vm385_vm9, %v1550_v39, 0.0  ;;  %vm421_vm10 = vcmp.eq.s32.totalorder %v365_v51, 1  ;;  %vm473_vm11 = vcmp.eq.s32.totalorder %v365_v51, 16  ;;  %vm525_vm12 = vcmp.eq.s32.totalorder %v365_v51, 17 }
  0xca   : > { %883 = vmatpush3.msra.mxu0 %v563_v58  ;;  %v510_v54 = vadd.f32 %v494_v57, %v458_v59  ;;  %v441_v61 = vsel %vm421_vm10, %v1557_v45, 0.0  ;;  %v493_v62 = vsel %vm473_vm11, %v1559_v46, 0.0  ;;  %v545_v63 = vsel %vm525_vm12, %v1561_v47, 0.0 }
  0xcb   : > { %884 = vmatprep.subr.mxu0 %v1256_v23  ;;  %v457_v0 = vadd.f32 %v441_v61, %v405_v60  ;;  %vm384_vm13 = vcmp.eq.s32.totalorder %v364_v52, 0  ;;  %vm420_vm14 = vcmp.eq.s32.totalorder %v364_v52, 1  ;;  %vm472_vm15 = vcmp.eq.s32.totalorder %v364_v52, 16 }
  0xcc   : > { %v562_v1 = vadd.f32 %v546_v30, %v510_v54  ;;  %v404_v2 = vsel %vm384_vm13, %v1550_v39, 0.0  ;;  %v440_v3 = vsel %vm420_vm14, %v1557_v45, 0.0  ;;  %v492_v4 = vsel %vm472_vm15, %v1559_v46, 0.0  ;;  %v576_v39 = vld [vmem:[#allocation2] sm:$0xf] }
  0xcd   : > { %v509_v5 = vadd.f32 %v493_v62, %v457_v0  ;;  %v456_v6 = vadd.f32 %v440_v3, %v404_v2  ;;  %vm524_vm0 = vcmp.eq.s32.totalorder %v364_v52, 17 }
  0xce   : > { %885 = vmatpush3.msra.mxu0 %v562_v1  ;;  %v544_v7 = vsel %vm524_vm0, %v1561_v47, 0.0 }
  0xcf   : > { %886 = vmatprep.subr.mxu0 %v1256_v23  ;;  %v561_v8 = vadd.f32 %v545_v63, %v509_v5  ;;  %v508_v9 = vadd.f32 %v492_v4, %v456_v6 }
  0xd1   : > { %887 = vmatpush3.msra.mxu0 %v561_v8  ;;  %v560_v10 = vadd.f32 %v544_v7, %v508_v9 }
  0xd2   : > { %888 = vmatprep.subr.mxu0 %v1256_v23 }
  0xd3   : > { %889 = vmatpush3.msra.mxu0 %v560_v10 }
  0xd4   : > { %891 = vmatmul.mubr.f32.vlgmr.msra.gmra.mxu0 %v577_v11 }
 0x193   : > { %653 = sbr.rel (%p835_p7) target bundleno = 416 (0x1a0), region = 52 }
 0x194   : > { %v644_v45 = vpop.f32.mrf.mxu0 }
 0x195   : > { %v648_v46 = vadd.f32 %v644_v45, %v576_v39 }
 0x196   : > { %v892_v12 = vpop.f32.mrf.mxu0 }
 0x197   : > { %649 = vst [vmem:[#allocation2] sm:$0xf] %v648_v46 }
 0x19e   : > { %v654_v47 = vld [vmem:[#allocation2] sm:$0xf] }
 0x19f   : > { %655 = vst [vmem:[%s1526_s12] sm:$0xf] %v654_v47 }
 0x1a0 PF: > { %s1834_s10 = sld [smem:[#allocation18_spill]]  ;;  %s672_s20 = sshll.u32 %s1526_s12, 4  ;;  %s673_s20 = int_to_ptr.vmem [resolvable:$true] %s672_s20 }
 0x1a1   : > { %s1835_s4 = sld [smem:[#allocation17_spill]]  ;;  %s657_s8 = scalar_lea.sflag [#allocation7], %s1518_s29 }
 0x1a2   : > { %s1836_s3 = sld [smem:[#allocation22_spill]]  ;;  %s1110_s11 = scalar_lea.vmem %s673_s20, 64 }
 0x1a3   : > { %s1837_s6 = sld [smem:[#allocation28_spill]]  ;;  %p1111_p0 = scmp.ne.s32.totalorder %s673_s20, %s1110_s11 }
 0x1a4   : > { %s1258_s1 = smov [#allocation11]  }
 0x1a5   : > { %s1114_s18 = sshll.u32 %s1258_s1, 4  ;;  %s1115_s18 = int_to_ptr.vmem [resolvable:$false] %s1114_s18 }
 0x1a6   : > { %s837_s28 = sshll.u32 %s1834_s10, 1  ;;  %s1116_s22 = scalar_lea.vmem %s1115_s18, 128 }
 0x1a7   : > { %s668_s27 = sadd.s32 %s1835_s4, %s837_s28  ;;  %p1117_p3 = scmp.lt.s32.totalorder %s673_s20, %s1115_s18 }
 0x1a8   : > { %s838_s21 = sshll.u32 %s668_s27, 6  ;;  %p1838_p6 = scmp.ne.s32.totalorder %s1836_s3, 0 }
 0x1a9   : > { %s670_s7 = scalar_lea.hbm %s1837_s6, %s838_s21  ;;  %p1118_p13 = scmp.lt.s32.totalorder %s1116_s22, %s1110_s11 }
 0x1aa   : > { %p1112_p12 = pnand %p1111_p0, %p1838_p6 }
 0x1ab   : > { %p1119_p1 = por %p1118_p13, %p1117_p3 }
 0x1ac   : > { %p1113_p10 = pneg %p1112_p12 }
 0x1ae   : > { %p1120_p5 = pnand %p1119_p1, %p1113_p10 }
 0x1b0   : > { %1123 = shalt.err (!%p1120_p5)
}
 0x1b1   : > { %s1124_s12 = scalar_lea.hbm %s670_s7, 64  ;;  %s1128_s25 = scalar_lea.hbm %s1837_s6, 256 }
 0x1b2   : > { %p1125_p9 = scmp.ne.s32.totalorder %s670_s7, %s1124_s12  ;;  %p1129_p4 = scmp.lt.s32.totalorder %s670_s7, %s1837_s6 }
 0x1b3   : > { %p1130_p11 = scmp.lt.s32.totalorder %s1128_s25, %s1124_s12 }
 0x1b4   : > { %p1126_p8 = pnand %p1125_p9, %p1838_p6 }
 0x1b5   : > { %p1131_p7 = por %p1130_p11, %p1129_p4 }
 0x1b6   : > { %p1127_p2 = pneg %p1126_p8 }
 0x1b8   : > { %p1132_p0 = pnand %p1131_p7, %p1127_p2 }
 0x1ba   : > { %1135 = shalt.err (!%p1132_p0)
}
 0x1bb   : > { %901 = dma.vmem_to_hbm [thread:$0]  (%p1838_p6), %s673_s20, 64, %s670_s7, %s657_s8  }
 0x1bc PF: > { %s1839_s4 = sld [smem:[#allocation15_spill]]  ;;  %p918_p12 = scmp.ge.s32.totalorder %s1250_s24, 2 }
 0x1bd   : > { %s1840_s28 = sld [smem:[#allocation23_spill]] }
 0x1c2   : > { %s684_s27 = sand.u32 1, %s1839_s4  }
 0x1c3   : > { %p1841_p10 = scmp.ne.s32.totalorder %s1840_s28, 0  ;;  %s685_s21 = scalar_lea.sflag [#allocation7], %s684_s27 }
 0x1c5   : > { %p914_p3 = pnand %p918_p12, %p1841_p10 }
 0x1c7   : > { %p915_p13 = pneg %p914_p3 }
 0x1c9   : > { %1197 = dma.done.wait (%p915_p13), %s685_s21, 64  }
 0x1ca   : > { %1199 = vsyncadd (%p915_p13), %s685_s21, 4294967232  ;;  %s22_s24 = sadd.s32 1, %s1250_s24   ;;  %s1843_s18 = sld [smem:[#allocation19_spill]] }
 0x1cb   : > { %p1731_p1 = scmp.ge.s32.totalorder %s22_s24, 10   ;;  %s1844_s3 = sld [smem:[#allocation20_spill]] }
 0x1cc   : > { %s1845_s21 = sld [smem:[#allocation24_spill]]  ;;  %s1847_s12 = smov %s1206_s13 }
 0x1cd   : > { %s1846_s22 = sld [smem:[#allocation25_spill]]  ;;  %s1848_s13 = smov %s1210_s14 }
 0x1ce   : > { %s1849_s14 = smov %s1486_s19  ;;  %s1850_s15 = smov %s1218_s16 }
 0x1cf   : > { %s1851_s16 = smov %s1222_s17  ;;  %s1852_s17 = smov %s1481_s2 }
 0x1d0   : > { %s1854_s20 = smov %s1246_s23  ;;  %s1855_s23 = smov %s1865_s5 }
 0x1d1   : > { %s1853_s19 = smov %s1844_s3  ;;  %21 = sbr.rel (!%p1731_p1) target bundleno = 16 (0x10), region = 109 }
 0x1d6   :  { %690 = vsyncpa [#allocation6], 1 }
 0x1d7   :  { %692 = vsyncpa [#allocation6 + $0x1], 1 }
 0x1d8   :  { %693 = vsyncpa [#allocation9], 1 }
 0x1d9   :  { %695 = vsyncpa [#allocation9 + $0x1], 1 }
 0x1da   :  { %696 = vsyncpa [#allocation7], 1 }
 0x1db   :  { %698 = vsyncpa [#allocation7 + $0x1], 1 }

</bundles_post_ra>
